<compile_context>
chip_gen: v7x
topology: tpu7x:2x2x1
jax: 0.10.0
libtpu: 0.0.40
codegen_flags: <defaults>
</compile_context>

<pallas_src>
import jax
import jax.numpy as jnp
from jax.experimental import pallas as pl
from jax.experimental.pallas import tpu as pltpu


def _outconv_kernel(w_ref, b_ref, x_ref, o_ref):
    # w_ref: VMEM (Cout, Cin) f32   (single tiny tile, resident)
    # b_ref: VMEM (Cout, 1)   f32
    # x_ref: VMEM (nb, Cin, T)      input block  (T = lane tile of H*W)
    # o_ref: VMEM (nb, Cout, T)     output block
    nb, cin, _ = x_ref.shape
    w = w_ref[...]                                   # (Cout, Cin)
    b = b_ref[...]                                   # (Cout, 1)
    for n in range(nb):                              # nb is small and static
        x = x_ref[n].astype(jnp.float32)             # (Cin, T), lane-dense
        # (Cout,1) * (1,T) broadcast FMAs accumulate directly into (Cout, T).
        acc = w[:, 0:1] * x[0:1, :] + b
        for c in range(1, cin):
            acc = acc + w[:, c:c + 1] * x[c:c + 1, :]
        o_ref[n] = acc.astype(o_ref.dtype)           # one lane-dense store


def outconv_pallas(x_nchw, weight, bias, *, target_block_bytes=2 * 1024 * 1024):
    """1x1 conv (UNet OutConv) via Pallas, computed directly in NCHW.

    x_nchw: (N, Cin, H, W)
    weight: (Cout, Cin, 1, 1)   (PyTorch Conv2d layout)
    bias:   (Cout,)
    returns (N, Cout, H, W)
    """
    N, Cin, H, W = x_nchw.shape
    Cout = weight.shape[0]
    HW = H * W

    # Free trailing-dim merge: spatial goes on the lane axis.
    x3 = x_nchw.reshape(N, Cin, HW)

    # Bytes of (input + output) per H*W lane per image.
    lane_bytes = (Cin + Cout) * x3.dtype.itemsize

    if HW * lane_bytes <= target_block_bytes:
        # Small-spatial regime: whole image spatial per block (block dim ==
        # full array dim, so no 128-divisibility needed) and pack several
        # images per grid step to amortize per-step overhead.
        t = HW
        nb = max(1, min(N, target_block_bytes // max(HW * lane_bytes, 1)))
        # Keep at least two grid steps when the batch allows it (v7x megacore).
        if N >= 2:
            nb = max(1, min(nb, N // 2))
        # Avoid a ragged batch block: shrink nb to a divisor of N.
        while N % nb:
            nb -= 1
    else:
        # Large-spatial regime: 128-multiple lane tile sized so each step
        # moves ~target_block_bytes; the last H*W tile may be ragged.
        nb = 1
        t = min(HW, max(128, (target_block_bytes // lane_bytes) // 128 * 128))

    # Tiny parameter tensors as one f32 VMEM tile each.
    w2 = weight.reshape(Cout, Cin).astype(jnp.float32)
    b2 = bias.reshape(Cout, 1).astype(jnp.float32)

    grid = (pl.cdiv(N, nb), pl.cdiv(HW, t))

    out3 = pl.pallas_call(
        _outconv_kernel,
        out_shape=jax.ShapeDtypeStruct((N, Cout, HW), x_nchw.dtype),
        grid=grid,
        in_specs=[
            pl.BlockSpec((Cout, Cin), lambda b, j: (0, 0)),      # weights
            pl.BlockSpec((Cout, 1), lambda b, j: (0, 0)),        # bias
            pl.BlockSpec((nb, Cin, t), lambda b, j: (b, 0, j)),  # input block
        ],
        out_specs=pl.BlockSpec((nb, Cout, t), lambda b, j: (b, 0, j)),
        compiler_params=pltpu.CompilerParams(
            dimension_semantics=("parallel", "parallel"),
            # Headroom for tile sweeps; v5e's default scoped VMEM is 16 MiB.
            vmem_limit_bytes=32 * 1024 * 1024,
        ),
    )(w2, b2, x3)

    return out3.reshape(N, Cout, H, W)


def _reference(x, weight, bias):
    Cout, Cin = weight.shape[0], weight.shape[1]
    return (jnp.einsum("nchw,oc->nohw", x, weight.reshape(Cout, Cin))
            + bias.reshape(1, Cout, 1, 1))


if __name__ == "__main__":
    key = jax.random.PRNGKey(0)
    k_x, k_w, k_b, k_x2, k_x3, k_x4 = jax.random.split(key, 6)

    N, Cin, H, W = 2, 4, 16, 16
    Cout = 3

    x = jax.random.normal(k_x, (N, Cin, H, W), dtype=jnp.float32)
    bound = 1.0 / (Cin ** 0.5)
    weight = jax.random.uniform(k_w, (Cout, Cin, 1, 1), minval=-bound,
                                maxval=bound, dtype=jnp.float32)
    bias = jax.random.uniform(k_b, (Cout,), minval=-bound, maxval=bound,
                              dtype=jnp.float32)

    out = jax.block_until_ready(outconv_pallas(x, weight, bias))
    ref = _reference(x, weight, bias)
    assert out.shape == (N, Cout, H, W)
    assert jnp.allclose(out, ref, atol=1e-5, rtol=1e-5)

    # Non-128-multiple spatial size: whole-image block path (t == HW).
    x2 = jax.random.normal(k_x2, (1, Cin, 10, 13), dtype=jnp.float32)
    out2 = jax.block_until_ready(outconv_pallas(x2, weight, bias))
    assert out2.shape == (1, Cout, 10, 13)
    assert jnp.allclose(out2, _reference(x2, weight, bias), atol=1e-5, rtol=1e-5)

    # Multi-image-per-step path (nb > 1) in the small-spatial regime.
    x3 = jax.random.normal(k_x3, (4, Cin, 16, 16), dtype=jnp.float32)
    out3 = jax.block_until_ready(outconv_pallas(x3, weight, bias))
    assert out3.shape == (4, Cout, 16, 16)
    assert jnp.allclose(out3, _reference(x3, weight, bias), atol=1e-5, rtol=1e-5)

    # Tiled-HW path with a ragged last lane tile (forced via a tiny budget).
    x4 = jax.random.normal(k_x4, (1, Cin, 12, 20), dtype=jnp.float32)
    out4 = jax.block_until_ready(
        outconv_pallas(x4, weight, bias, target_block_bytes=4096))
    assert out4.shape == (1, Cout, 12, 20)
    assert jnp.allclose(out4, _reference(x4, weight, bias), atol=1e-5, rtol=1e-5)

    print("KERNEL_OK")
</pallas_src>

<mosaic_0001>
module attributes {stable_mosaic.version = 11 : i64} {
  func.func @_outconv_kernel(%arg0: i32, %arg1: i32, %arg2: memref<3x4xf32, #tpu.memory_space<vmem>>, %arg3: memref<3x1xf32, #tpu.memory_space<vmem>>, %arg4: memref<1x4x256xf32, #tpu.memory_space<vmem>>, %arg5: memref<1x3x256xf32, #tpu.memory_space<vmem>>) attributes {dimension_semantics = [#tpu.dimension_semantics<parallel>, #tpu.dimension_semantics<parallel>], iteration_bounds = array<i64: 2, 1>, scalar_prefetch = 0 : i64, scratch_operands = 0 : i64, tpu.core_type = #tpu.core_type<tc>, window_params = [{pipeline_mode = #tpu.pipeline_mode<synchronous>, transform_indices = @transform_0, window_bounds = array<i64: 3, 4>}, {pipeline_mode = #tpu.pipeline_mode<synchronous>, transform_indices = @transform_1, window_bounds = array<i64: 3, 1>}, {transform_indices = @transform_2, window_bounds = array<i64: 1, 4, 256>}, {transform_indices = @transform_3, window_bounds = array<i64: 1, 3, 256>}]} {
    %c0 = arith.constant 0 : index
    %c0_0 = arith.constant 0 : index
    %0 = vector.load %arg2[%c0, %c0_0] : memref<3x4xf32, #tpu.memory_space<vmem>>, vector<3x4xf32>
    %c0_1 = arith.constant 0 : index
    %c0_2 = arith.constant 0 : index
    %1 = vector.load %arg3[%c0_1, %c0_2] : memref<3x1xf32, #tpu.memory_space<vmem>>, vector<3x1xf32>
    %c0_3 = arith.constant 0 : index
    %c0_4 = arith.constant 0 : index
    %c0_5 = arith.constant 0 : index
    %2 = vector.load %arg4[%c0_3, %c0_4, %c0_5] : memref<1x4x256xf32, #tpu.memory_space<vmem>>, vector<1x4x256xf32>
    %3 = vector.shape_cast %2 : vector<1x4x256xf32> to vector<4x256xf32>
    %4 = vector.extract_strided_slice %0 {offsets = [0, 0], sizes = [3, 1], strides = [1, 1]} : vector<3x4xf32> to vector<3x1xf32>
    %5 = vector.extract_strided_slice %3 {offsets = [0, 0], sizes = [1, 256], strides = [1, 1]} : vector<4x256xf32> to vector<1x256xf32>
    %6 = vector.broadcast %4 : vector<3x1xf32> to vector<3x256xf32>
    %7 = vector.broadcast %5 : vector<1x256xf32> to vector<3x256xf32>
    %8 = arith.mulf %6, %7 : vector<3x256xf32>
    %9 = vector.broadcast %1 : vector<3x1xf32> to vector<3x256xf32>
    %10 = arith.addf %8, %9 : vector<3x256xf32>
    %11 = vector.extract_strided_slice %0 {offsets = [0, 1], sizes = [3, 1], strides = [1, 1]} : vector<3x4xf32> to vector<3x1xf32>
    %12 = vector.extract_strided_slice %3 {offsets = [1, 0], sizes = [1, 256], strides = [1, 1]} : vector<4x256xf32> to vector<1x256xf32>
    %13 = vector.broadcast %11 : vector<3x1xf32> to vector<3x256xf32>
    %14 = vector.broadcast %12 : vector<1x256xf32> to vector<3x256xf32>
    %15 = arith.mulf %13, %14 : vector<3x256xf32>
    %16 = arith.addf %10, %15 : vector<3x256xf32>
    %17 = vector.extract_strided_slice %0 {offsets = [0, 2], sizes = [3, 1], strides = [1, 1]} : vector<3x4xf32> to vector<3x1xf32>
    %18 = vector.extract_strided_slice %3 {offsets = [2, 0], sizes = [1, 256], strides = [1, 1]} : vector<4x256xf32> to vector<1x256xf32>
    %19 = vector.broadcast %17 : vector<3x1xf32> to vector<3x256xf32>
    %20 = vector.broadcast %18 : vector<1x256xf32> to vector<3x256xf32>
    %21 = arith.mulf %19, %20 : vector<3x256xf32>
    %22 = arith.addf %16, %21 : vector<3x256xf32>
    %23 = vector.extract_strided_slice %0 {offsets = [0, 3], sizes = [3, 1], strides = [1, 1]} : vector<3x4xf32> to vector<3x1xf32>
    %24 = vector.extract_strided_slice %3 {offsets = [3, 0], sizes = [1, 256], strides = [1, 1]} : vector<4x256xf32> to vector<1x256xf32>
    %25 = vector.broadcast %23 : vector<3x1xf32> to vector<3x256xf32>
    %26 = vector.broadcast %24 : vector<1x256xf32> to vector<3x256xf32>
    %27 = arith.mulf %25, %26 : vector<3x256xf32>
    %28 = arith.addf %22, %27 : vector<3x256xf32>
    %c0_6 = arith.constant 0 : index
    %c0_7 = arith.constant 0 : index
    %c0_8 = arith.constant 0 : index
    %29 = vector.load %arg5[%c0_6, %c0_7, %c0_8] : memref<1x3x256xf32, #tpu.memory_space<vmem>>, vector<1x3x256xf32>
    %30 = vector.shape_cast %29 : vector<1x3x256xf32> to vector<3x256xf32>
    %31 = vector.shape_cast %28 : vector<3x256xf32> to vector<1x3x256xf32>
    tpu.vector_store %arg5[%c0_6, %c0_7, %c0_8], %31 {strides = array<i32>} : memref<1x3x256xf32, #tpu.memory_space<vmem>>, vector<1x3x256xf32>,
    return
  }
  func.func @transform_0(%arg0: i32, %arg1: i32) -> (i32, i32) {
    %c0_i32 = arith.constant 0 : i32
    %c0_i32_0 = arith.constant 0 : i32
    %c0_i32_1 = arith.constant 0 : i32
    return %c0_i32, %c0_i32_0 : i32, i32
  }
  func.func @transform_1(%arg0: i32, %arg1: i32) -> (i32, i32) {
    %c0_i32 = arith.constant 0 : i32
    %c0_i32_0 = arith.constant 0 : i32
    %c0_i32_1 = arith.constant 0 : i32
    return %c0_i32, %c0_i32_0 : i32, i32
  }
  func.func @transform_2(%arg0: i32, %arg1: i32) -> (i32, i32, i32) {
    %c0_i32 = arith.constant 0 : i32
    %c0_i32_0 = arith.constant 0 : i32
    return %arg0, %c0_i32, %arg1 : i32, i32, i32
  }
  func.func @transform_3(%arg0: i32, %arg1: i32) -> (i32, i32, i32) {
    %c0_i32 = arith.constant 0 : i32
    %c0_i32_0 = arith.constant 0 : i32
    return %arg0, %c0_i32, %arg1 : i32, i32, i32
  }
}

</mosaic_0001>

<bundles_post_ra>
// kernel: tpu_custom_call.1
= control target key start
LH: loop header
LB: loop body
LE: loop exit
PB: predicated region body
PF: predicated region fallthrough
CT: control target
= control target key end

     0   :  { %8 = vsyncpa [#allocation3], 0  ;;  %s747_s0 = inlined_call_operand.vmem [shape: f32[3,4], index: 0, kind: input, shape index: {}]   ;;  %s748_s1 = inlined_call_operand.vmem [shape: f32[3,1], index: 1, kind: input, shape index: {}]   ;;  %s749_s2 = inlined_call_operand.hbm [shape: f32[2,4,256], index: 2, kind: input, shape index: {}]   ;;  %s750_s3 = inlined_call_operand.vmem [shape: f32[2,3,256], index: 3, kind: output, shape index: {}]  }
   0x1   :  { %10 = vsyncpa [#allocation3 + $0x1], 0  ;;  %s616_s12 = smov 0   ;;  %s618_s13 = smov 0  }
   0x2   :  { %s620_s14 = smov 0   ;;  %s622_s15 = smov 0  }
   0x3   :  { %s624_s16 = smov 0   ;;  %s626_s17 = smov 0  }
   0x4 LB: > { %s431_s18 = sadd.s32 4294967295, %s589_s17   ;;  %s28_s19 = sadd.s32 1, %s585_s16  ;;  %s589_s17 = sphi %s626_s17, %s16_s17   ;;  %s585_s16 = sphi %s624_s16, %s760_s16   ;;  %s581_s15 = sphi %s622_s15, %s759_s15   ;;  %s577_s14 = sphi %s620_s14, %s758_s14   ;;  %s573_s13 = sphi %s618_s13, %s757_s13   ;;  %s569_s12 = sphi %s616_s12, %s756_s12  }
   0x5   : > { %p30_p0 = scmp.ge.s32.totalorder %s28_s19, 2  ;;  %s79_s20 = sadd.s32 1, %s577_s14 }
   0x6   : > { %p86_p1 = scmp.ne.s32.totalorder %s577_s14, %s573_s13  ;;  %p87_p2 = scmp.eq.s32.totalorder %s589_s17, 0 }
   0x7   : > { %s762_s19 = smov (%p30_p0, %s28_s19), 0  ;;  %p92_p4 = scmp.ne.s32.totalorder %s573_s13, %s569_s12 }
   0x8   : > { %p652_p3 = por %p87_p2, %p86_p1  ;;  %s74_s22 = ssub.s32 %s585_s16, %s762_s19 }
   0x9   : > { %p93_p5 = scmp.eq.s32.totalorder %s431_s18, 0  ;;  %p77_p6 = scmp.eq.s32.totalorder %s74_s22, 0 }
   0xa   : > { %p452_p8 = scmp.lt.s32.totalorder %s589_s17, 2  ;;  %s150_s25 = sand.u32 1, %s577_s14  }
   0xb   : > { %p659_p7 = por %p93_p5, %p92_p4  ;;  %s444_s26 = sshll.u32 %s585_s16, 7 }
   0xc   : > { %s665_s24 = scalar_select %p77_p6, %s577_s14, %s79_s20  }
   0xd   : > { %s435_s27 = sshll.u32 %s150_s25, 3  ;;  %s672_s30 = scalar_lea.hbm %s749_s2, %s444_s26 }
   0xe   : > { %s154_s4 = scalar_lea.vmem [#allocation2], %s435_s27  ;;  %p676_p9 = pnand %p452_p8, %p652_p3 }
   0xf   : > { %s164_s5 = sshll.u32 %s154_s4, 4  ;;  %s151_s7 = scalar_lea.sflag [#allocation3], %s150_s25  ;;  %s680_s5 = int_to_ptr.vmem [resolvable:$true] %s164_s5 }
  0x10   : > { %s509_s8 = scalar_lea.hbm %s672_s30, 128  ;;  %p511_p13 = pneg %p676_p9 }
  0x11   : > { %p510_p12 = scmp.ne.s32.totalorder %s672_s30, %s509_s8  ;;  %s514_s11 = scalar_lea.hbm %s749_s2, 256 }
  0x12   : > { %p515_p2 = scmp.lt.u32.totalorder %s672_s30, %s749_s2  ;;  %p516_p3 = scmp.lt.u32.totalorder %s514_s11, %s509_s8 }
  0x13   : > { %p512_p0 = pnand %p511_p13, %p510_p12  ;;  %p518_p5 = scmp.lt.u32.totalorder %s509_s8, %s672_s30 }
  0x14   : > { %p517_p4 = por %p516_p3, %p515_p2 }
  0x15   : > { %p513_p1 = pneg %p512_p0 }
  0x16   : > { %p519_p6 = por %p518_p5, %p517_p4 }
  0x18   : > { %p520_p8 = pnand %p519_p6, %p513_p1 }
  0x1a   : > { %523 = shalt.err (!%p520_p8)
}
  0x1b   : > { %s524_s20 = scalar_lea.vmem %s680_s5, 128  ;;  %s591_s21 = smov [#allocation2]  }
  0x1c   : > { %p525_p12 = scmp.ne.s32.totalorder %s680_s5, %s524_s20  ;;  %s529_s22 = sshll.u32 %s591_s21, 4  ;;  %s530_s22 = int_to_ptr.vmem [resolvable:$false] %s529_s22 }
  0x1d   : > { %s531_s25 = scalar_lea.vmem %s530_s22, 256  ;;  %p532_p11 = scmp.lt.s32.totalorder %s680_s5, %s530_s22 }
  0x1e   : > { %p527_p0 = pnand %p525_p12, %p511_p13  ;;  %p533_p2 = scmp.lt.s32.totalorder %s531_s25, %s524_s20 }
  0x20   : > { %p528_p10 = pneg %p527_p0  ;;  %p534_p3 = por %p533_p2, %p532_p11 }
  0x22   : > { %p535_p4 = pnand %p534_p3, %p528_p10 }
  0x24   : > { %538 = shalt.err (!%p535_p4)
}
  0x25   : > { %451 = dma.hbm_to_vmem [thread:$0]  (!%p676_p9), %s672_s30, 128, %s680_s5, %s151_s7  }
  0x26   : > { %p754_p1 = scmp.lt.s32.totalorder %s589_s17, 3  ;;  %p755_p5 = scmp.ge.s32.totalorder %s589_s17, 1 }
  0x28   : > { %p170_p13 = pnand %p755_p5, %p754_p1 }
  0x29   : > { %s175_s26 = sand.u32 (!%p170_p13), 1, %s573_s13  }
  0x2a   : > { %173 = sbr.rel (%p170_p13) target bundleno = 196 (0xc4), region = 32  ;;  %s439_s27 = sshll.u32 (!%p170_p13), %s175_s26, 3 }
  0x2b   : > { %s176_s28 = scalar_lea.sflag (!%p170_p13), [#allocation3], %s175_s26  ;;  %s179_s29 = scalar_lea.vmem (!%p170_p13), [#allocation2], %s439_s27 }
  0x31   : > { %564 = dma.done.wait (%p659_p7), %s176_s28, 128  }
  0x32   : > { %566 = vsyncadd (%p659_p7), %s176_s28, 4294967168  ;;  %v592_v0 = vmov 0   ;;  %v593_v1 = vmov 1   ;;  %v217_v2 = vld [vmem:[%s747_s0] sm:$0x7]  ;;  %v594_v4 = vmov 2   ;;  %v226_v6 = vlaneseq }
  0x33   : > { %505 = vset.pattern.permute.xlu0 %v592_v0  ;;  %506 = vset.pattern.permute.xlu1 %v593_v1  ;;  %v218_v3 = vld [vmem:[%s748_s1] sm:$0x7]  ;;  %v595_v5 = vmov 3   ;;  %p208_p7 = scmp.lt.s32.totalorder %s581_s15, 1 }
  0x34   : > { %222 = vperm.xlu0 %505, %v217_v2   ;;  %254 = vperm.xlu1 %506, %v217_v2   ;;  %v227_v7 = vshrl.u32 %v226_v6, 7  ;;  %v219_v10 = vld [vmem:[%s179_s29] sm:$0xff] }
  0x35   : > { %s764_s15 = smov (!%p208_p7, %s581_s15), 1 }
  0x36   : > { %v228_v8 = vsub.s32 0, %v227_v7  ;;  %v232_v9 = vsub.s32 4, %v227_v7  ;;  %v259_v11 = vsub.s32 1, %v227_v7  ;;  %v263_v12 = vsub.s32 5, %v227_v7  ;;  %s445_s23 = sshll.u32 %s764_s15, 3 }
  0x37   : > { %v285_v13 = vsub.s32 2, %v227_v7  ;;  %v289_v14 = vsub.s32 6, %v227_v7  ;;  %v311_v21 = vsub.s32 3, %v227_v7  ;;  %v315_v22 = vsub.s32 7, %v227_v7  ;;  %s215_s9 = scalar_lea.vmem %s750_s3, %s445_s23 }
  0x38   : > { %248 = vperm.xlu0 %505, %v218_v3   ;;  %507 = vset.pattern.permute.xlu1 %v594_v4  ;;  %v229_v15 = vrot.slane %v219_v10, %v228_v8  ;;  %v233_v16 = vrot.slane %v219_v10, %v232_v9  ;;  %v260_v17 = vrot.slane %v219_v10, %v259_v11 }
  0x39   : > { %280 = vperm.xlu1 %507, %v217_v2   ;;  %v264_v18 = vrot.slane %v219_v10, %v263_v12  ;;  %v286_v19 = vrot.slane %v219_v10, %v285_v13  ;;  %v290_v20 = vrot.slane %v219_v10, %v289_v14  ;;  %v312_v31 = vrot.slane %v219_v10, %v311_v21 }
  0x3a   : > { %v239_v23 = vrot.slane %v229_v15, %v228_v8  ;;  %v243_v24 = vrot.slane %v233_v16, %v228_v8  ;;  %v270_v27 = vrot.slane %v260_v17, %v259_v11  ;;  %v316_v32 = vrot.slane %v219_v10, %v315_v22 }
  0x3b   : > { %v274_v28 = vrot.slane %v264_v18, %v259_v11  ;;  %v296_v29 = vrot.slane %v286_v19, %v285_v13  ;;  %v300_v30 = vrot.slane %v290_v20, %v285_v13  ;;  %v322_v43 = vrot.slane %v312_v31, %v311_v21 }
  0x3c   : > { %508 = vset.pattern.permute.xlu0 %v595_v5  ;;  %v326_v44 = vrot.slane %v316_v32, %v311_v21 }
  0x3d   : > { %306 = vperm.xlu0 %508, %v217_v2  }
  0xb3   : > { %v223_v25 = vpop.permute.xlu0 %222  ;;  %v255_v26 = vpop.permute.xlu1 %254 }
  0xb4   : > { %v244_v33 = vmul.f32 %v239_v23, %v223_v25  ;;  %v245_v34 = vmul.f32 %v243_v24, %v223_v25  ;;  %v275_v36 = vmul.f32 %v270_v27, %v255_v26  ;;  %v276_v37 = vmul.f32 %v274_v28, %v255_v26 }
  0xb7   : > { %v249_v35 = vpop.permute.xlu0 %248 }
  0xb8   : > { %v251_v38 = vadd.f32 %v249_v35, %v244_v33  ;;  %v252_v39 = vadd.f32 %v249_v35, %v245_v34  ;;  %v281_v40 = vpop.permute.xlu1 %280 }
  0xb9   : > { %v301_v41 = vmul.f32 %v296_v29, %v281_v40  ;;  %v302_v42 = vmul.f32 %v300_v30, %v281_v40 }
  0xba   : > { %v277_v45 = vadd.f32 %v275_v36, %v251_v38  ;;  %v278_v46 = vadd.f32 %v276_v37, %v252_v39 }
  0xbc   : > { %v303_v47 = vadd.f32 %v301_v41, %v277_v45  ;;  %v304_v48 = vadd.f32 %v302_v42, %v278_v46  ;;  %v307_v49 = vpop.permute.xlu0 %306 }
  0xbd   : > { %v327_v50 = vmul.f32 %v322_v43, %v307_v49  ;;  %v328_v51 = vmul.f32 %v326_v44, %v307_v49 }
  0xbf   : > { %v329_v52 = vadd.f32 %v327_v50, %v303_v47  ;;  %v330_v53 = vadd.f32 %v328_v51, %v304_v48 }
  0xc1   : > { %v333_v54 = vcombine.low %v329_v52, %v330_v53 }
  0xc3   : > { %335 = vst [vmem:[%s215_s9] sm:$0x77] %v333_v54 }
  0xc4 PF: > { %s16_s17 = sadd.s32 1, %s589_s17   ;;  %s756_s12 = smov %s573_s13 }
  0xc5   : > { %p13_p9 = scmp.ge.s32.totalorder %s16_s17, 4   ;;  %s757_s13 = smov %s577_s14 }
  0xc6   : > { %s758_s14 = smov %s665_s24  ;;  %s759_s15 = smov %s585_s16 }
  0xc7   : > { %s760_s16 = smov %s762_s19  ;;  %15 = sbr.rel (!%p13_p9) target bundleno = 4 (0x4), region = 72 }
  0xce   :  { %366 = vsyncpa [#allocation3], 1 }
  0xcf   :  { %368 = vsyncpa [#allocation3 + $0x1], 1 }

</bundles_post_ra>
